<compile_context>
chip_gen: v7x
topology: tpu7x:2x2x1
jax: 0.10.0
libtpu: 0.0.40
codegen_flags: <defaults>
</compile_context>

<pallas_src>
import math

import jax
import jax.numpy as jnp
from jax.experimental import pallas as pl
from jax.experimental.pallas import tpu as pltpu

_LANE = 128


def _bias_relu_kernel(h_ref, b_ref, o_ref):
    # h_ref: (tile_r, tile_c), b_ref: (1, tile_c), o_ref: (tile_r, tile_c)
    # Bias broadcast over rows (VPU add) + ReLU (VPU max). Pure elementwise.
    o_ref[...] = jnp.maximum(h_ref[...] + b_ref[...], 0.0).astype(o_ref.dtype)


def _node_apply_impl(h, bias, *, target_block_bytes=4 * 1024 * 1024):
    """h: (N, F), bias: (F,) -> relu(h + bias), same shape/dtype as h.

    NOTE: `h` is donated by the jit wrapper below; callers must not reuse it
    after the call (the output aliases its HBM buffer).
    """
    N, F = h.shape
    itemsize = jnp.dtype(h.dtype).itemsize

    # --- layout: make the last (lane) axis dense when F < 128 ---------------
    # With F=32 only 32/128 lanes per vreg are used and every store is a
    # masked partial vst. Since bias+ReLU is elementwise we can view (N, F)
    # as (N*F/128, 128) and tile the bias to 128 lanes — pure layout plumbing.
    if F < _LANE and _LANE % F == 0 and (N * F) % _LANE == 0:
        h2 = h.reshape(N * F // _LANE, _LANE)
        bias2 = jnp.tile(bias, _LANE // F).reshape(1, _LANE)
    else:
        # TODO(synk): for awkward F < 128, pad the feature dim to 128 at the
        # layer level; this fallback leaves lanes masked on every store.
        h2 = h
        bias2 = bias.reshape(1, F)
    R, C = h2.shape
    row_bytes = C * itemsize

    # --- column tiling -------------------------------------------------------
    # Prefer full-width row slabs: fully contiguous HBM DMAs, bias block index
    # constant (fetched once, stays resident), and a 1D grid. Only fall back to
    # lane-aligned column stripes when a single 8-row slab blows the budget.
    if 8 * row_bytes <= target_block_bytes or C <= 512 or C % _LANE != 0:
        tile_c = C
    else:
        tile_c = 512

    # --- row tiling -----------------------------------------------------------
    # ~target_block_bytes per block: big enough to amortize the ~0.35 us/step
    # grid overhead and approach the HBM roofline. Double-buffered in+out is
    # ~4x block bytes (~16 MiB at 4 MiB blocks); vmem_limit_bytes below raises
    # v5e's 16 MiB scoped default so this fits on every generation
    # (physical VMEM: 128 MiB v5e/v6e, 64 MiB per TC on v7x).
    tile_r = (target_block_bytes // (tile_c * itemsize)) // 8 * 8
    tile_r = int(min(max(8, tile_r), R))
    n_row_tiles = pl.cdiv(R, tile_r)

    # v7x megacore: give each of the 2 TensorCores >= 2 row blocks to pipeline
    # (>= 4 blocks total), but only when the array is big enough that the
    # resulting blocks are still fat DMAs (>= ~512 KiB each).
    if n_row_tiles < 4 and R >= 32 and (R // 4) * tile_c * itemsize >= (512 << 10):
        tile_r = int(min(max(8, ((R + 3) // 4 + 7) // 8 * 8), R))
        n_row_tiles = pl.cdiv(R, tile_r)

    if tile_c == C:
        grid = (n_row_tiles,)
        in_specs = [
            pl.BlockSpec((tile_r, C), lambda i: (i, 0)),
            pl.BlockSpec((1, C), lambda i: (0, 0)),  # constant index: resident
        ]
        out_specs = pl.BlockSpec((tile_r, C), lambda i: (i, 0))
        dim_sem = ("parallel",)
    else:
        grid = (n_row_tiles, pl.cdiv(C, tile_c))
        in_specs = [
            pl.BlockSpec((tile_r, tile_c), lambda i, j: (i, j)),
            pl.BlockSpec((1, tile_c), lambda i, j: (0, j)),
        ]
        out_specs = pl.BlockSpec((tile_r, tile_c), lambda i, j: (i, j))
        dim_sem = ("parallel", "parallel")

    out2 = pl.pallas_call(
        _bias_relu_kernel,
        out_shape=jax.ShapeDtypeStruct((R, C), h.dtype),
        grid_spec=pltpu.PrefetchScalarGridSpec(
            num_scalar_prefetch=0,
            grid=grid,
            in_specs=in_specs,
            out_specs=out_specs,
        ),
        compiler_params=pltpu.CompilerParams(
            dimension_semantics=dim_sem,
            vmem_limit_bytes=32 * 1024 * 1024,
        ),
        # h is donated at the jit boundary, so this alias is genuinely in-place
        # (no hidden XLA copy of h into a writable buffer).
        input_output_aliases={0: 0},
    )(h2, bias2)

    return out2.reshape(N, F)


# donate_argnums=0: the output reuses h's HBM buffer via the alias above.
node_apply = jax.jit(_node_apply_impl, donate_argnums=0)


def node_apply_ref(h, bias):
    return jnp.maximum(h + bias[None, :], 0.0)


if __name__ == "__main__":
    key = jax.random.PRNGKey(0)
    k_h, k_b, k_h2 = jax.random.split(key, 3)

    # --- case 1: shapes matching the GCN example (narrow F -> lane repack) ---
    N = 8           # number of graph nodes
    out_feats = 32  # hidden feature dim

    h = jax.random.normal(k_h, (N, out_feats), dtype=jnp.float32)
    # deterministic bias init matching reset_parameters():
    #   stdv = 1/sqrt(out_feats); bias ~ U(-stdv, stdv)
    stdv = 1.0 / math.sqrt(out_feats)
    bias = jax.random.uniform(
        k_b, (out_feats,), dtype=jnp.float32, minval=-stdv, maxval=stdv
    )

    ref = node_apply_ref(h, bias)            # compute ref BEFORE donating h
    out = jax.block_until_ready(node_apply(h, bias))
    assert out.shape == (N, out_feats)
    assert jnp.allclose(out, ref, atol=1e-6), "mismatch vs reference (case 1)"

    # --- case 2: more nodes / wider features (full-width 1D-grid path) -------
    N2, F2 = 128, 256
    h_big = jax.random.normal(k_h2, (N2, F2), dtype=jnp.float32)
    stdv2 = 1.0 / math.sqrt(F2)
    bias_big = jax.random.uniform(
        k_b, (F2,), dtype=jnp.float32, minval=-stdv2, maxval=stdv2
    )
    ref_big = node_apply_ref(h_big, bias_big)  # before donation
    out_big = jax.block_until_ready(node_apply(h_big, bias_big))
    assert out_big.shape == (N2, F2)
    assert jnp.allclose(out_big, ref_big, atol=1e-6), "mismatch vs reference (case 2)"

    print("KERNEL_OK")
</pallas_src>

<mosaic_0001>
module attributes {stable_mosaic.version = 11 : i64} {
  func.func @_bias_relu_kernel(%arg0: i32, %arg1: memref<2x128xf32, #tpu.memory_space<vmem>>, %arg2: memref<1x128xf32, #tpu.memory_space<vmem>>, %arg3: memref<2x128xf32, #tpu.memory_space<vmem>>) attributes {dimension_semantics = [#tpu.dimension_semantics<parallel>], iteration_bounds = array<i64: 1>, scalar_prefetch = 0 : i64, scratch_operands = 0 : i64, tpu.core_type = #tpu.core_type<tc>, window_params = [{transform_indices = @transform_0, window_bounds = array<i64: 2, 128>}, {pipeline_mode = #tpu.pipeline_mode<synchronous>, transform_indices = @transform_1, window_bounds = array<i64: 1, 128>}, {transform_indices = @transform_2, window_bounds = array<i64: 2, 128>}]} {
    %c0 = arith.constant 0 : index
    %c0_0 = arith.constant 0 : index
    %0 = vector.load %arg1[%c0, %c0_0] : memref<2x128xf32, #tpu.memory_space<vmem>>, vector<2x128xf32>
    %c0_1 = arith.constant 0 : index
    %c0_2 = arith.constant 0 : index
    %1 = vector.load %arg2[%c0_1, %c0_2] : memref<1x128xf32, #tpu.memory_space<vmem>>, vector<1x128xf32>
    %2 = vector.broadcast %1 : vector<1x128xf32> to vector<2x128xf32>
    %3 = arith.addf %0, %2 : vector<2x128xf32>
    %cst = arith.constant 0.000000e+00 : f32
    %4 = vector.broadcast %cst : f32 to vector<2x128xf32>
    %5 = arith.maximumf %3, %4 : vector<2x128xf32>
    %c0_3 = arith.constant 0 : index
    %c0_4 = arith.constant 0 : index
    %6 = vector.load %arg3[%c0_3, %c0_4] : memref<2x128xf32, #tpu.memory_space<vmem>>, vector<2x128xf32>
    tpu.vector_store %arg3[%c0_3, %c0_4], %5 {strides = array<i32>} : memref<2x128xf32, #tpu.memory_space<vmem>>, vector<2x128xf32>,
    return
  }
  func.func @transform_0(%arg0: i32) -> (i32, i32) {
    %c0_i32 = arith.constant 0 : i32
    %c0_i32_0 = arith.constant 0 : i32
    return %arg0, %c0_i32 : i32, i32
  }
  func.func @transform_1(%arg0: i32) -> (i32, i32) {
    %c0_i32 = arith.constant 0 : i32
    %c0_i32_0 = arith.constant 0 : i32
    %c0_i32_1 = arith.constant 0 : i32
    return %c0_i32, %c0_i32_0 : i32, i32
  }
  func.func @transform_2(%arg0: i32) -> (i32, i32) {
    %c0_i32 = arith.constant 0 : i32
    %c0_i32_0 = arith.constant 0 : i32
    return %arg0, %c0_i32 : i32, i32
  }
}

</mosaic_0001>

<bundles_post_ra>
// kernel: tile.8
= control target key start
LH: loop header
LB: loop body
LE: loop exit
PB: predicated region body
PF: predicated region fallthrough
CT: control target
= control target key end

     0   :  { %s22_s0 = inlined_call_operand.vmem [shape: f32[32], index: 0, kind: input, shape index: {}]   ;;  %s23_s1 = inlined_call_operand.vmem [shape: f32[4,32], index: 1, kind: output, shape index: {}]  }
   0x1   :  { %v4_v0 = vld [vmem:[%s22_s0] ss:$0 sm:$0xff] }
   0x2   :  { %5 = vst [vmem:[%s23_s1] sm:$0xf] %v4_v0 }

// kernel: tile.9
= control target key start
LH: loop header
LB: loop body
LE: loop exit
PB: predicated region body
PF: predicated region fallthrough
CT: control target
= control target key end

     0   :  { %vm7_vm0 = vcmask 261120   ;;  %s37_s8 = smov 32   ;;  %s38_s9 = smov 64   ;;  %vm13_vm1 = vcmask 1048320   ;;  %vm19_vm2 = vcmask 785920   ;;  %vm25_vm3 = vcmask 523520   ;;  %s55_s0 = inlined_call_operand.vmem [shape: f32[4,32], index: 0, kind: input, shape index: {}]   ;;  %s56_s1 = inlined_call_operand.vmem [shape: f32[1,128], index: 1, kind: output, shape index: {}]  }
   0x1   :  { %v4_v0 = vld [vmem:[%s55_s0] sm:$0xf]  ;;  %s36_s0 = smov 96  }
   0x2   :  { %5 = vst [vmem:[#allocation1] sm:$0xf] %v4_v0 }
   0x9   :  { %v10_v1 = vld [vmem:[#allocation1 + $0x3] sm:$0x1]   ;;  %v22_v2 = vld [vmem:[#allocation1 + $0x1] sm:$0x1]   ;;  %v6_v3 = vld [vmem:[#allocation1] sm:$0x1]  }
   0xa   :  { %11 = vrot.lane.b32.xlu0 %v10_v1, %s36_s0  ;;  %23 = vrot.lane.b32.xlu1 %v22_v2, %s37_s8  ;;  %v16_v4 = vld [vmem:[#allocation1 + $0x2] sm:$0x1]   ;;  %8 = vst.msk [vmem:[#allocation0] sm:$0x1] %vm7_vm0, %v6_v3  }
   0xe   :  { %17 = vrot.lane.b32.xlu0 %v16_v4, %s38_s9 }
  0x7c   :  { %v12_v5 = vpop.permute.xlu0 %11   ;;  %v24_v6 = vpop.permute.xlu1 %23  }
  0x7d   :  { %14 = vst.msk [vmem:[#allocation0] sm:$0x1] %vm13_vm1, %v12_v5  }
  0x80   :  { %v18_v7 = vpop.permute.xlu0 %17  }
  0x81   :  { %20 = vst.msk [vmem:[#allocation0] sm:$0x1] %vm19_vm2, %v18_v7  }
  0x82   :  { %26 = vst.msk [vmem:[#allocation0] sm:$0x1] %vm25_vm3, %v24_v6  }
  0x89   :  { %v30_v8 = vld [vmem:[#allocation0] sm:$0x1] }
  0x8a   :  { %32 = vst [vmem:[%s56_s1] sm:$0x1] %v30_v8 }

// kernel: _node_apply_impl.1
= control target key start
LH: loop header
LB: loop body
LE: loop exit
PB: predicated region body
PF: predicated region fallthrough
CT: control target
= control target key end

     0   :  { %s51_s0 = inlined_call_operand.vmem [shape: f32[2,128], index: 0, kind: input, shape index: {}, may-alias: {0,2}]   ;;  %s52_s1 = inlined_call_operand.vmem [shape: f32[1,128], index: 1, kind: input, shape index: {}]   ;;  %s53_s2 = inlined_call_operand.vmem [shape: f32[2,128], index: 2, kind: output, shape index: {}, may-alias: {0,2}]  }
   0x1   :  { %v11_v0 = vld [vmem:[%s51_s0] sm:$0x3] }
   0x2   :  { %v26_v1 = vld [vmem:[%s52_s1] ss:$0 sm:$0xff] }
   0x3   :  { %v19_v2 = vadd.f32 %v26_v1, %v11_v0 }
   0x5   :  { %v20_v3 = vmax.f32 %v19_v2, 0.0 }
   0x7   :  { %21 = vst [vmem:[%s53_s2] sm:$0x3] %v20_v3 }

</bundles_post_ra>
